<compile_context>
chip_gen: v7x
topology: tpu7x:2x2x1
jax: 0.10.0
libtpu: 0.0.40
codegen_flags: <defaults>
</compile_context>

<pallas_src>
import jax
import jax.numpy as jnp
from jax.experimental import pallas as pl
from jax.experimental.pallas import tpu as pltpu


def _round_up(x, m):
    return (x + m - 1) // m * m


def _vmem_capacity_bytes():
    """Physical VMEM of the current TPU generation (conservative 64 MiB fallback)."""
    try:
        cap = getattr(pltpu.get_tpu_info(), "vmem_capacity_bytes", None)
        if cap:
            return int(cap)
    except Exception:
        pass
    return 64 << 20


def make_mlp_kernel(num_linear):
    """Fused MLP kernel for `num_linear` Linear layers.

    Kernel ref order: (x_ref, w0, b0, w1, b1, ..., w_{L-1}, b_{L-1}, o_ref).
    x/w refs hold the matmul operands (bf16 or f32), biases are f32.
    """

    def kernel(*refs):
        x_ref = refs[0]
        o_ref = refs[-1]
        params = refs[1:-1]

        h = x_ref[...]
        for li in range(num_linear):
            w = params[2 * li][...]
            b = params[2 * li + 1][...]
            # MXU matmul with f32 accumulation; bias add + activation in f32.
            acc = jnp.dot(h, w, preferred_element_type=jnp.float32) + b
            if li == num_linear - 1:
                o_ref[...] = acc.astype(o_ref.dtype)      # logits, no activation
            else:
                acc = jnp.tanh(acc) if li == 0 else jnp.maximum(acc, 0.0)
                h = acc.astype(x_ref.dtype)               # narrow h between layers

    return kernel


def prepare_mlp_params(weights, biases, compute_dtype=jnp.bfloat16):
    """One-time padding + dtype cast of the parameters (hoisted out of forward).

    Every feature/hidden/class dim is zero-padded to a multiple of 128 lanes so
    MXU tiles are aligned and the output is lane-dense.  Padding to 256 would
    better fill v6e/v7x 256x256 MXU tiles for large hidden sizes, but for small
    models it only adds DMA/VMEM cost, so 128 (exact for v5e) is kept.
    """
    assert len(weights) == len(biases) and len(weights) >= 2
    dims = [weights[0].shape[0]] + [w.shape[1] for w in weights]
    pdims = [_round_up(d, 128) for d in dims]

    param_args = []
    for li, (w, b) in enumerate(zip(weights, biases)):
        pin, pout = pdims[li], pdims[li + 1]
        wp = jnp.zeros((pin, pout), compute_dtype)
        wp = wp.at[: w.shape[0], : w.shape[1]].set(w.astype(compute_dtype))
        bp = jnp.zeros((1, pout), jnp.float32)
        bp = bp.at[:, : b.shape[1]].set(b.astype(jnp.float32))
        param_args += [wp, bp]

    return {
        "params": tuple(param_args),
        "dims": tuple(dims),
        "pdims": tuple(pdims),
        "compute_dtype": compute_dtype,
        "num_linear": len(weights),
    }


def feedforward_forward(x, prepared, *, batch_tile=1024, out_dtype=None):
    """Run the fused MLP Pallas kernel on pre-padded parameters.

    x:        [batch, n_features] float32
    prepared: output of prepare_mlp_params (padded, cast, cached across calls)
    returns logits: [batch, n_classes] in `out_dtype` (default: compute dtype).
    """
    params = prepared["params"]
    dims = prepared["dims"]
    pdims = prepared["pdims"]
    compute_dtype = prepared["compute_dtype"]
    num_linear = prepared["num_linear"]

    batch, n_features = x.shape
    assert n_features == dims[0]
    n_classes = dims[-1]
    if out_dtype is None:
        out_dtype = compute_dtype          # halves logits writeback traffic for bf16
    itemsize = jnp.dtype(compute_dtype).itemsize
    out_itemsize = jnp.dtype(out_dtype).itemsize

    # ---- generation-aware VMEM budget (v5e/v6e: 128 MiB, v7x: 64 MiB) ----
    vmem_cap = _vmem_capacity_bytes()
    headroom = max(8 << 20, vmem_cap // 8)        # leave Mosaic scratch headroom
    budget = vmem_cap - headroom

    # Params are single-buffered (grid-invariant index_map) -> counted once.
    param_bytes = sum(int(a.size) * a.dtype.itemsize for a in params)

    # ---- batch tile: sized from the VMEM budget, sublane-pack aligned ----
    align = 16 if itemsize < 4 else 8             # bf16 packs 2 rows / sublane
    row_bytes = (2 * pdims[0] * itemsize          # double-buffered x tile
                 + 2 * pdims[-1] * out_itemsize   # double-buffered logits tile
                 + max(pdims) * 4                 # live f32 accumulator
                 + max(pdims) * itemsize)         # inter-layer h
    tb_vmem = max(align, (budget - param_bytes - (4 << 20)) // max(row_bytes, 1))
    tb = int(min(batch_tile, tb_vmem))
    batch_al = _round_up(batch, align)
    if batch_al >= 2 * align:
        # Keep >= 2 grid steps when the batch allows (engages both v7x TensorCores).
        tb = min(tb, max(align, (batch_al // 2) // align * align))
    tb = max(align, min(tb, batch_al))
    tb = (tb // align) * align
    batch_p = _round_up(batch, tb)
    grid = (batch_p // tb,)

    # ---- per-call work: only pad/cast x (params already prepared) ----
    x_p = jnp.zeros((batch_p, pdims[0]), compute_dtype)
    x_p = x_p.at[:batch, :n_features].set(x.astype(compute_dtype))

    # ---- VMEM request + cost estimate ----
    tile_bytes = 2 * tb * pdims[0] * itemsize + 2 * tb * pdims[-1] * out_itemsize
    live_bytes = tb * max(pdims) * 4 + tb * max(pdims) * itemsize
    needed = param_bytes + tile_bytes + live_bytes + (4 << 20)
    vmem_limit = int(min(budget, max(32 << 20, needed)))
    # TODO(synk): if `needed > budget` (huge hidden layers), switch to a K/N-tiled
    # reduction grid with streamed weight tiles instead of a resident-weight kernel.

    flops = 2 * batch_p * sum(pdims[i] * pdims[i + 1] for i in range(num_linear))
    bytes_accessed = (batch_p * pdims[0] * itemsize + param_bytes
                      + batch_p * pdims[-1] * out_itemsize)
    cost = pl.CostEstimate(flops=flops,
                           transcendentals=batch_p * pdims[1],
                           bytes_accessed=bytes_accessed)

    kernel = make_mlp_kernel(num_linear)

    def build(single_buffer_params):
        in_specs = [pl.BlockSpec((tb, pdims[0]), lambda i: (i, 0))]
        for a in params:
            if single_buffer_params:
                # Same block every grid step -> single-buffered VMEM-resident param.
                spec = pl.BlockSpec(a.shape, lambda i: (0, 0),
                                    pipeline_mode=pl.Buffered(1))
            else:
                spec = pl.BlockSpec(a.shape, lambda i: (0, 0))
            in_specs.append(spec)
        out_spec = pl.BlockSpec((tb, pdims[-1]), lambda i: (i, 0))
        return pl.pallas_call(
            kernel,
            out_shape=jax.ShapeDtypeStruct((batch_p, pdims[-1]), out_dtype),
            grid=grid,
            in_specs=in_specs,
            out_specs=out_spec,
            cost_estimate=cost,
            compiler_params=pltpu.CompilerParams(
                dimension_semantics=("parallel",),  # batch tiles shard across TCs
                vmem_limit_bytes=vmem_limit,
            ),
        )

    try:
        out_p = build(single_buffer_params=True)(x_p, *params)
    except Exception:
        # Defensive fallback: default double-buffering if Buffered(1) is rejected
        # by the installed Pallas version.
        out_p = build(single_buffer_params=False)(x_p, *params)

    # Strip batch / class padding in plain JAX.
    return out_p[:batch, :n_classes]


def init_params(key, n_features, hidden_size, n_classes, layers):
    """Deterministic parameter init (uniform, scaled by 1/sqrt(fan_in))."""
    dims = [n_features] + [hidden_size] * layers + [n_classes]
    weights, biases = [], []
    for i in range(len(dims) - 1):
        fan_in, fan_out = dims[i], dims[i + 1]
        key, kw, kb = jax.random.split(key, 3)
        bound = 1.0 / jnp.sqrt(jnp.float32(fan_in))
        w = jax.random.uniform(
            kw, (fan_in, fan_out), jnp.float32, minval=-bound, maxval=bound)
        b = jax.random.uniform(
            kb, (1, fan_out), jnp.float32, minval=-bound, maxval=bound)
        weights.append(w)
        biases.append(b)
    return weights, biases


def reference_forward(x, weights, biases):
    """Pure-JAX reference matching the PyTorch module (eval mode, tanh act)."""
    h = x
    num_linear = len(weights)
    for li, (w, b) in enumerate(zip(weights, biases)):
        h = h @ w + b
        if li < num_linear - 1:
            h = jnp.tanh(h) if li == 0 else jnp.maximum(h, 0.0)
    return h


if __name__ == "__main__":
    # FeedforwardNetwork(n_classes=4, n_features=32, hidden_size=32,
    #                    layers=2, activation_type='tanh', dropout=0.0)
    n_classes, n_features, hidden_size, layers = 4, 32, 32, 2
    batch = 2

    key = jax.random.PRNGKey(0)
    key, kx = jax.random.split(key)
    x = jax.random.normal(kx, (batch, n_features), jnp.float32)
    weights, biases = init_params(key, n_features, hidden_size, n_classes, layers)

    ref = reference_forward(x, weights, biases)

    # f32 compute path: tight numerical check of the module semantics.
    prep_f32 = prepare_mlp_params(weights, biases, compute_dtype=jnp.float32)
    out_f32 = jax.block_until_ready(feedforward_forward(x, prep_f32))
    assert out_f32.shape == (batch, n_classes)
    assert jnp.allclose(out_f32, ref, atol=1e-5, rtol=1e-5), (out_f32, ref)

    # Default performance path: bf16 operands + bf16 logits, f32 accumulation.
    # Params are padded/cast ONCE here and reused for every subsequent call.
    prep_bf16 = prepare_mlp_params(weights, biases)
    out = jax.block_until_ready(feedforward_forward(x, prep_bf16))
    assert out.shape == (batch, n_classes)
    assert jnp.allclose(out.astype(jnp.float32), ref, atol=5e-2, rtol=5e-2), (out, ref)

    print("KERNEL_OK")
</pallas_src>

<mosaic_0001>
module attributes {stable_mosaic.version = 11 : i64} {
  func.func @kernel(%arg0: i32, %arg1: memref<8x128xf32, #tpu.memory_space<vmem>>, %arg2: memref<128x128xf32, #tpu.memory_space<vmem>>, %arg3: memref<1x128xf32, #tpu.memory_space<vmem>>, %arg4: memref<128x128xf32, #tpu.memory_space<vmem>>, %arg5: memref<1x128xf32, #tpu.memory_space<vmem>>, %arg6: memref<128x128xf32, #tpu.memory_space<vmem>>, %arg7: memref<1x128xf32, #tpu.memory_space<vmem>>, %arg8: memref<8x128xf32, #tpu.memory_space<vmem>>) attributes {dimension_semantics = [#tpu.dimension_semantics<parallel>], iteration_bounds = array<i64: 1>, scalar_prefetch = 0 : i64, scratch_operands = 0 : i64, tpu.core_type = #tpu.core_type<tc>, window_params = [{transform_indices = @transform_0, window_bounds = array<i64: 8, 128>}, {pipeline_mode = #tpu.pipeline_mode<synchronous>, transform_indices = @transform_1, window_bounds = array<i64: 128, 128>}, {pipeline_mode = #tpu.pipeline_mode<synchronous>, transform_indices = @transform_2, window_bounds = array<i64: 1, 128>}, {pipeline_mode = #tpu.pipeline_mode<synchronous>, transform_indices = @transform_3, window_bounds = array<i64: 128, 128>}, {pipeline_mode = #tpu.pipeline_mode<synchronous>, transform_indices = @transform_4, window_bounds = array<i64: 1, 128>}, {pipeline_mode = #tpu.pipeline_mode<synchronous>, transform_indices = @transform_5, window_bounds = array<i64: 128, 128>}, {pipeline_mode = #tpu.pipeline_mode<synchronous>, transform_indices = @transform_6, window_bounds = array<i64: 1, 128>}, {transform_indices = @transform_7, window_bounds = array<i64: 8, 128>}]} {
    %c0 = arith.constant 0 : index
    %c0_0 = arith.constant 0 : index
    %0 = vector.load %arg1[%c0, %c0_0] : memref<8x128xf32, #tpu.memory_space<vmem>>, vector<8x128xf32>
    %c0_1 = arith.constant 0 : index
    %c0_2 = arith.constant 0 : index
    %1 = vector.load %arg2[%c0_1, %c0_2] : memref<128x128xf32, #tpu.memory_space<vmem>>, vector<128x128xf32>
    %c0_3 = arith.constant 0 : index
    %c0_4 = arith.constant 0 : index
    %2 = vector.load %arg3[%c0_3, %c0_4] : memref<1x128xf32, #tpu.memory_space<vmem>>, vector<1x128xf32>
    %cst = arith.constant dense<0.000000e+00> : vector<8x128xf32>
    %3 = tpu.matmul %0, %1, %cst {dimension_numbers = #tpu.dot_dimension_numbers<[1], [0], [0], [1], [0, 0, 1, 1], [], []>} : vector<8x128xf32>, vector<128x128xf32>, vector<8x128xf32> -> vector<8x128xf32>
    %4 = vector.broadcast %2 : vector<1x128xf32> to vector<8x128xf32>
    %5 = arith.addf %3, %4 : vector<8x128xf32>
    %6 = math.tanh %5 : vector<8x128xf32>
    %c0_5 = arith.constant 0 : index
    %c0_6 = arith.constant 0 : index
    %7 = vector.load %arg4[%c0_5, %c0_6] : memref<128x128xf32, #tpu.memory_space<vmem>>, vector<128x128xf32>
    %c0_7 = arith.constant 0 : index
    %c0_8 = arith.constant 0 : index
    %8 = vector.load %arg5[%c0_7, %c0_8] : memref<1x128xf32, #tpu.memory_space<vmem>>, vector<1x128xf32>
    %cst_9 = arith.constant dense<0.000000e+00> : vector<8x128xf32>
    %9 = tpu.matmul %6, %7, %cst_9 {dimension_numbers = #tpu.dot_dimension_numbers<[1], [0], [0], [1], [0, 0, 1, 1], [], []>} : vector<8x128xf32>, vector<128x128xf32>, vector<8x128xf32> -> vector<8x128xf32>
    %10 = vector.broadcast %8 : vector<1x128xf32> to vector<8x128xf32>
    %11 = arith.addf %9, %10 : vector<8x128xf32>
    %cst_10 = arith.constant 0.000000e+00 : f32
    %12 = vector.broadcast %cst_10 : f32 to vector<8x128xf32>
    %13 = arith.maximumf %11, %12 : vector<8x128xf32>
    %c0_11 = arith.constant 0 : index
    %c0_12 = arith.constant 0 : index
    %14 = vector.load %arg6[%c0_11, %c0_12] : memref<128x128xf32, #tpu.memory_space<vmem>>, vector<128x128xf32>
    %c0_13 = arith.constant 0 : index
    %c0_14 = arith.constant 0 : index
    %15 = vector.load %arg7[%c0_13, %c0_14] : memref<1x128xf32, #tpu.memory_space<vmem>>, vector<1x128xf32>
    %cst_15 = arith.constant dense<0.000000e+00> : vector<8x128xf32>
    %16 = tpu.matmul %13, %14, %cst_15 {dimension_numbers = #tpu.dot_dimension_numbers<[1], [0], [0], [1], [0, 0, 1, 1], [], []>} : vector<8x128xf32>, vector<128x128xf32>, vector<8x128xf32> -> vector<8x128xf32>
    %17 = vector.broadcast %15 : vector<1x128xf32> to vector<8x128xf32>
    %18 = arith.addf %16, %17 : vector<8x128xf32>
    %c0_16 = arith.constant 0 : index
    %c0_17 = arith.constant 0 : index
    %19 = vector.load %arg8[%c0_16, %c0_17] : memref<8x128xf32, #tpu.memory_space<vmem>>, vector<8x128xf32>
    tpu.vector_store %arg8[%c0_16, %c0_17], %18 {strides = array<i32>} : memref<8x128xf32, #tpu.memory_space<vmem>>, vector<8x128xf32>,
    return
  }
  func.func @transform_0(%arg0: i32) -> (i32, i32) {
    %c0_i32 = arith.constant 0 : i32
    %c0_i32_0 = arith.constant 0 : i32
    return %arg0, %c0_i32 : i32, i32
  }
  func.func @transform_1(%arg0: i32) -> (i32, i32) {
    %c0_i32 = arith.constant 0 : i32
    %c0_i32_0 = arith.constant 0 : i32
    %c0_i32_1 = arith.constant 0 : i32
    return %c0_i32, %c0_i32_0 : i32, i32
  }
  func.func @transform_2(%arg0: i32) -> (i32, i32) {
    %c0_i32 = arith.constant 0 : i32
    %c0_i32_0 = arith.constant 0 : i32
    %c0_i32_1 = arith.constant 0 : i32
    return %c0_i32, %c0_i32_0 : i32, i32
  }
  func.func @transform_3(%arg0: i32) -> (i32, i32) {
    %c0_i32 = arith.constant 0 : i32
    %c0_i32_0 = arith.constant 0 : i32
    %c0_i32_1 = arith.constant 0 : i32
    return %c0_i32, %c0_i32_0 : i32, i32
  }
  func.func @transform_4(%arg0: i32) -> (i32, i32) {
    %c0_i32 = arith.constant 0 : i32
    %c0_i32_0 = arith.constant 0 : i32
    %c0_i32_1 = arith.constant 0 : i32
    return %c0_i32, %c0_i32_0 : i32, i32
  }
  func.func @transform_5(%arg0: i32) -> (i32, i32) {
    %c0_i32 = arith.constant 0 : i32
    %c0_i32_0 = arith.constant 0 : i32
    %c0_i32_1 = arith.constant 0 : i32
    return %c0_i32, %c0_i32_0 : i32, i32
  }
  func.func @transform_6(%arg0: i32) -> (i32, i32) {
    %c0_i32 = arith.constant 0 : i32
    %c0_i32_0 = arith.constant 0 : i32
    %c0_i32_1 = arith.constant 0 : i32
    return %c0_i32, %c0_i32_0 : i32, i32
  }
  func.func @transform_7(%arg0: i32) -> (i32, i32) {
    %c0_i32 = arith.constant 0 : i32
    %c0_i32_0 = arith.constant 0 : i32
    return %arg0, %c0_i32 : i32, i32
  }
}

module attributes {stable_mosaic.version = 11 : i64} {
  func.func @kernel(%arg0: i32, %arg1: memref<8x128xf32, #tpu.memory_space<vmem>>, %arg2: memref<128x128xf32, #tpu.memory_space<vmem>>, %arg3: memref<1x128xf32, #tpu.memory_space<vmem>>, %arg4: memref<128x128xf32, #tpu.memory_space<vmem>>, %arg5: memref<1x128xf32, #tpu.memory_space<vmem>>, %arg6: memref<128x128xf32, #tpu.memory_space<vmem>>, %arg7: memref<1x128xf32, #tpu.memory_space<vmem>>, %arg8: memref<8x128xf32, #tpu.memory_space<vmem>>) attributes {dimension_semantics = [#tpu.dimension_semantics<parallel>], iteration_bounds = array<i64: 1>, scalar_prefetch = 0 : i64, scratch_operands = 0 : i64, tpu.core_type = #tpu.core_type<tc>, window_params = [{transform_indices = @transform_0, window_bounds = array<i64: 8, 128>}, {pipeline_mode = #tpu.pipeline_mode<synchronous>, transform_indices = @transform_1, window_bounds = array<i64: 128, 128>}, {pipeline_mode = #tpu.pipeline_mode<synchronous>, transform_indices = @transform_2, window_bounds = array<i64: 1, 128>}, {pipeline_mode = #tpu.pipeline_mode<synchronous>, transform_indices = @transform_3, window_bounds = array<i64: 128, 128>}, {pipeline_mode = #tpu.pipeline_mode<synchronous>, transform_indices = @transform_4, window_bounds = array<i64: 1, 128>}, {pipeline_mode = #tpu.pipeline_mode<synchronous>, transform_indices = @transform_5, window_bounds = array<i64: 128, 128>}, {pipeline_mode = #tpu.pipeline_mode<synchronous>, transform_indices = @transform_6, window_bounds = array<i64: 1, 128>}, {transform_indices = @transform_7, window_bounds = array<i64: 8, 128>}]} {
    %c0 = arith.constant 0 : index
    %c0_0 = arith.constant 0 : index
    %0 = vector.load %arg1[%c0, %c0_0] : memref<8x128xf32, #tpu.memory_space<vmem>>, vector<8x128xf32>
    %c0_1 = arith.constant 0 : index
    %c0_2 = arith.constant 0 : index
    %1 = vector.load %arg2[%c0_1, %c0_2] : memref<128x128xf32, #tpu.memory_space<vmem>>, vector<128x128xf32>
    %c0_3 = arith.constant 0 : index
    %c0_4 = arith.constant 0 : index
    %2 = vector.load %arg3[%c0_3, %c0_4] : memref<1x128xf32, #tpu.memory_space<vmem>>, vector<1x128xf32>
    %cst = arith.constant dense<0.000000e+00> : vector<8x128xf32>
    %3 = tpu.matmul %0, %1, %cst {dimension_numbers = #tpu.dot_dimension_numbers<[1], [0], [0], [1], [0, 0, 1, 1], [], []>} : vector<8x128xf32>, vector<128x128xf32>, vector<8x128xf32> -> vector<8x128xf32>
    %4 = vector.broadcast %2 : vector<1x128xf32> to vector<8x128xf32>
    %5 = arith.addf %3, %4 : vector<8x128xf32>
    %6 = math.tanh %5 : vector<8x128xf32>
    %c0_5 = arith.constant 0 : index
    %c0_6 = arith.constant 0 : index
    %7 = vector.load %arg4[%c0_5, %c0_6] : memref<128x128xf32, #tpu.memory_space<vmem>>, vector<128x128xf32>
    %c0_7 = arith.constant 0 : index
    %c0_8 = arith.constant 0 : index
    %8 = vector.load %arg5[%c0_7, %c0_8] : memref<1x128xf32, #tpu.memory_space<vmem>>, vector<1x128xf32>
    %cst_9 = arith.constant dense<0.000000e+00> : vector<8x128xf32>
    %9 = tpu.matmul %6, %7, %cst_9 {dimension_numbers = #tpu.dot_dimension_numbers<[1], [0], [0], [1], [0, 0, 1, 1], [], []>} : vector<8x128xf32>, vector<128x128xf32>, vector<8x128xf32> -> vector<8x128xf32>
    %10 = vector.broadcast %8 : vector<1x128xf32> to vector<8x128xf32>
    %11 = arith.addf %9, %10 : vector<8x128xf32>
    %cst_10 = arith.constant 0.000000e+00 : f32
    %12 = vector.broadcast %cst_10 : f32 to vector<8x128xf32>
    %13 = arith.maximumf %11, %12 : vector<8x128xf32>
    %c0_11 = arith.constant 0 : index
    %c0_12 = arith.constant 0 : index
    %14 = vector.load %arg6[%c0_11, %c0_12] : memref<128x128xf32, #tpu.memory_space<vmem>>, vector<128x128xf32>
    %c0_13 = arith.constant 0 : index
    %c0_14 = arith.constant 0 : index
    %15 = vector.load %arg7[%c0_13, %c0_14] : memref<1x128xf32, #tpu.memory_space<vmem>>, vector<1x128xf32>
    %cst_15 = arith.constant dense<0.000000e+00> : vector<8x128xf32>
    %16 = tpu.matmul %13, %14, %cst_15 {dimension_numbers = #tpu.dot_dimension_numbers<[1], [0], [0], [1], [0, 0, 1, 1], [], []>} : vector<8x128xf32>, vector<128x128xf32>, vector<8x128xf32> -> vector<8x128xf32>
    %17 = vector.broadcast %15 : vector<1x128xf32> to vector<8x128xf32>
    %18 = arith.addf %16, %17 : vector<8x128xf32>
    %c0_16 = arith.constant 0 : index
    %c0_17 = arith.constant 0 : index
    %19 = vector.load %arg8[%c0_16, %c0_17] : memref<8x128xf32, #tpu.memory_space<vmem>>, vector<8x128xf32>
    tpu.vector_store %arg8[%c0_16, %c0_17], %18 {strides = array<i32>} : memref<8x128xf32, #tpu.memory_space<vmem>>, vector<8x128xf32>,
    return
  }
  func.func @transform_0(%arg0: i32) -> (i32, i32) {
    %c0_i32 = arith.constant 0 : i32
    %c0_i32_0 = arith.constant 0 : i32
    return %arg0, %c0_i32 : i32, i32
  }
  func.func @transform_1(%arg0: i32) -> (i32, i32) {
    %c0_i32 = arith.constant 0 : i32
    %c0_i32_0 = arith.constant 0 : i32
    %c0_i32_1 = arith.constant 0 : i32
    return %c0_i32, %c0_i32_0 : i32, i32
  }
  func.func @transform_2(%arg0: i32) -> (i32, i32) {
    %c0_i32 = arith.constant 0 : i32
    %c0_i32_0 = arith.constant 0 : i32
    %c0_i32_1 = arith.constant 0 : i32
    return %c0_i32, %c0_i32_0 : i32, i32
  }
  func.func @transform_3(%arg0: i32) -> (i32, i32) {
    %c0_i32 = arith.constant 0 : i32
    %c0_i32_0 = arith.constant 0 : i32
    %c0_i32_1 = arith.constant 0 : i32
    return %c0_i32, %c0_i32_0 : i32, i32
  }
  func.func @transform_4(%arg0: i32) -> (i32, i32) {
    %c0_i32 = arith.constant 0 : i32
    %c0_i32_0 = arith.constant 0 : i32
    %c0_i32_1 = arith.constant 0 : i32
    return %c0_i32, %c0_i32_0 : i32, i32
  }
  func.func @transform_5(%arg0: i32) -> (i32, i32) {
    %c0_i32 = arith.constant 0 : i32
    %c0_i32_0 = arith.constant 0 : i32
    %c0_i32_1 = arith.constant 0 : i32
    return %c0_i32, %c0_i32_0 : i32, i32
  }
  func.func @transform_6(%arg0: i32) -> (i32, i32) {
    %c0_i32 = arith.constant 0 : i32
    %c0_i32_0 = arith.constant 0 : i32
    %c0_i32_1 = arith.constant 0 : i32
    return %c0_i32, %c0_i32_0 : i32, i32
  }
  func.func @transform_7(%arg0: i32) -> (i32, i32) {
    %c0_i32 = arith.constant 0 : i32
    %c0_i32_0 = arith.constant 0 : i32
    return %arg0, %c0_i32 : i32, i32
  }
}

</mosaic_0001>

<bundles_post_ra>
// kernel: tpu_custom_call.1
= control target key start
LH: loop header
LB: loop body
LE: loop exit
PB: predicated region body
PF: predicated region fallthrough
CT: control target
= control target key end

     0   :  { %12 = vsyncpa [#allocation3], 0  ;;  %s899_s0 = inlined_call_operand.hbm [shape: f32[8,128], index: 0, kind: input, shape index: {}]   ;;  %s900_s1 = inlined_call_operand.hbm [shape: f32[128,128], index: 1, kind: input, shape index: {}]   ;;  %s901_s2 = inlined_call_operand.vmem [shape: f32[1,128], index: 2, kind: input, shape index: {}]   ;;  %s902_s3 = inlined_call_operand.hbm [shape: f32[128,128], index: 3, kind: input, shape index: {}]   ;;  %s903_s4 = inlined_call_operand.vmem [shape: f32[1,128], index: 4, kind: input, shape index: {}]   ;;  %s904_s5 = inlined_call_operand.hbm [shape: f32[128,128], index: 5, kind: input, shape index: {}]   ;;  %s905_s6 = inlined_call_operand.vmem [shape: f32[1,128], index: 6, kind: input, shape index: {}]   ;;  %s906_s7 = inlined_call_operand.hbm [shape: f32[8,128], index: 7, kind: output, shape index: {}]  }
   0x1   :  { %13 = vsyncpa [#allocation6], 0 }
   0x2   :  { %14 = vsyncpa [#allocation9], 0 }
   0x3   :  { %15 = vsyncpa [#allocation4], 0  ;;  %s741_s24 = smov [#allocation5]   ;;  %s623_s28 = scalar_lea.hbm %s900_s1, 2048 }
   0x4   :  { %s31_s25 = sshll.u32 %s741_s24, 4  ;;  %p624_p0 = scmp.ne.s32.totalorder %s900_s1, %s623_s28  ;;  %s32_s25 = int_to_ptr.vmem [resolvable:$true] %s31_s25 }
   0x5   :  { %p627_p1 = scmp.lt.u32.totalorder %s623_s28, %s900_s1 }
   0x7   :  { %p629_p2 = pnand %p627_p1, %p624_p0 }
   0x9   :  { %632 = shalt.err (!%p629_p2)
}
   0xa   :  { %s633_s10 = scalar_lea.vmem %s32_s25, 2048  ;;  %p638_p4 = scmp.lt.s32.totalorder %s32_s25, %s32_s25 }
   0xb   :  { %p634_p3 = scmp.ne.s32.totalorder %s32_s25, %s633_s10  ;;  %p639_p5 = scmp.lt.s32.totalorder %s633_s10, %s633_s10 }
   0xd   :  { %p640_p6 = por %p639_p5, %p638_p4 }
   0xf   :  { %p641_p7 = pnand %p640_p6, %p634_p3 }
  0x11   :  { %644 = shalt.err (!%p641_p7)
}
  0x12   :  { %s742_s11 = smov 128   ;;  %s743_s12 = smov 8  }
  0x13   :  { %37 = dma.hbm_to_vmem [thread:$0]  %s900_s1, 2048, %s32_s25, [#allocation6], %s742_s11, %s742_s11, %s743_s12  }
  0x14   :  { %s744_s15 = smov [#allocation2]   ;;  %s745_s17 = smov [#allocation7]  }
  0x15   :  { %s22_s16 = sshll.u32 %s744_s15, 4  ;;  %s45_s18 = sshll.u32 %s745_s17, 4  ;;  %s23_s16 = int_to_ptr.vmem [resolvable:$true] %s22_s16  ;;  %s46_s18 = int_to_ptr.vmem [resolvable:$true] %s45_s18 }
  0x16   :  { %s645_s21 = scalar_lea.hbm %s899_s0, 128 }
  0x17   :  { %p646_p8 = scmp.ne.s32.totalorder %s899_s0, %s645_s21  ;;  %p649_p9 = scmp.lt.u32.totalorder %s645_s21, %s899_s0 }
  0x19   :  { %p651_p10 = pnand %p649_p9, %p646_p8 }
  0x1b   :  { %654 = shalt.err (!%p651_p10)
}
  0x1c   :  { %s655_s1 = scalar_lea.vmem %s23_s16, 128  ;;  %p660_p12 = scmp.lt.s32.totalorder %s23_s16, %s23_s16 }
  0x1d   :  { %p656_p11 = scmp.ne.s32.totalorder %s23_s16, %s655_s1  ;;  %p661_p13 = scmp.lt.s32.totalorder %s655_s1, %s655_s1 }
  0x1f   :  { %p662_p0 = por %p661_p13, %p660_p12 }
  0x21   :  { %p663_p1 = pnand %p662_p0, %p656_p11 }
  0x23   :  { %666 = shalt.err (!%p663_p1)
}
  0x24   :  { %25 = dma.hbm_to_vmem [thread:$0]  %s899_s0, 128, %s23_s16, [#allocation3]  }
  0x25   :  { %s667_s30 = scalar_lea.hbm %s902_s3, 2048 }
  0x26   :  { %p668_p2 = scmp.ne.s32.totalorder %s902_s3, %s667_s30  ;;  %p671_p3 = scmp.lt.u32.totalorder %s667_s30, %s902_s3 }
  0x28   :  { %p673_p4 = pnand %p671_p3, %p668_p2 }
  0x2a   :  { %676 = shalt.err (!%p673_p4)
}
  0x2b   :  { %s677_s14 = scalar_lea.vmem %s46_s18, 2048  ;;  %p682_p6 = scmp.lt.s32.totalorder %s46_s18, %s46_s18 }
  0x2c   :  { %p678_p5 = scmp.ne.s32.totalorder %s46_s18, %s677_s14  ;;  %p683_p7 = scmp.lt.s32.totalorder %s677_s14, %s677_s14 }
  0x2e   :  { %p684_p8 = por %p683_p7, %p682_p6 }
  0x30   :  { %p685_p9 = pnand %p684_p8, %p678_p5 }
  0x32   :  { %688 = shalt.err (!%p685_p9)
}
  0x33   :  { %51 = dma.hbm_to_vmem [thread:$0]  %s902_s3, 2048, %s46_s18, [#allocation6], %s742_s11, %s742_s11, %s743_s12  }
  0x34   :  { %s746_s16 = smov [#allocation8]   ;;  %s689_s21 = scalar_lea.hbm %s904_s5, 2048 }
  0x35   :  { %s59_s17 = sshll.u32 %s746_s16, 4  ;;  %p690_p10 = scmp.ne.s32.totalorder %s904_s5, %s689_s21  ;;  %s60_s17 = int_to_ptr.vmem [resolvable:$true] %s59_s17 }
  0x36   :  { %p693_p11 = scmp.lt.u32.totalorder %s689_s21, %s904_s5 }
  0x38   :  { %p695_p12 = pnand %p693_p11, %p690_p10 }
  0x3a   :  { %698 = shalt.err (!%p695_p12)
}
  0x3b   :  { %s699_s1 = scalar_lea.vmem %s60_s17, 2048  ;;  %p704_p0 = scmp.lt.s32.totalorder %s60_s17, %s60_s17 }
  0x3c   :  { %p700_p13 = scmp.ne.s32.totalorder %s60_s17, %s699_s1  ;;  %p705_p1 = scmp.lt.s32.totalorder %s699_s1, %s699_s1 }
  0x3e   :  { %p706_p2 = por %p705_p1, %p704_p0 }
  0x40   :  { %p707_p3 = pnand %p706_p2, %p700_p13 }
  0x42   :  { %710 = shalt.err (!%p707_p3)
}
  0x43   :  { %65 = dma.hbm_to_vmem [thread:$0]  %s904_s5, 2048, %s60_s17, [#allocation9], %s742_s11, %s742_s11, %s743_s12  }
  0x44   :  { %733 = dma.done.wait [#allocation3], 128  }
  0x45   :  { %734 = vsyncadd [#allocation3], 4294967168 }
  0x46   :  { %735 = dma.done.wait [#allocation6], 4096  }
  0x47   :  { %736 = vsyncadd [#allocation6], 4294963200 }
  0x48   :  { %737 = dma.done.wait [#allocation9], 2048  }
  0x49   :  { %738 = vsyncadd [#allocation9], 4294965248  ;;  %v747_v0 = vmov 0.0|0.0   ;;  %vm748_vm0 = vmmov 0   ;;  %v749_v1 = vmov 0.0   ;;  %v81_v2 = vld [vmem:[#allocation5] sm:$0xff] }
  0x4a   :  { %539 = vmatprep.subr.bf16.mxu0 %v747_v0  ;;  %466 = vmatprep.mubr.msk.f32.mxu0 %vm748_vm0, %v749_v1  ;;  %v82_v3 = vld [vmem:[#allocation5 + $0x8] sm:$0xff]  ;;  %v83_v4 = vld [vmem:[#allocation5 + $0x10] sm:$0xff]  ;;  %v84_v6 = vld [vmem:[#allocation5 + $0x18] sm:$0xff]  ;;  %s750_s28 = smov [#allocation10]  }
  0x4b   :  { %563 = vmatprep.subr.bf16.mxu1 %v747_v0  ;;  %501 = vmatprep.mubr.msk.f32.mxu1 %vm748_vm0, %v749_v1  ;;  %v540_v5 = vpack.c.bf16 %v82_v3, %v81_v2  ;;  %v543_v7 = vpack.c.bf16 %v84_v6, %v83_v4  ;;  %v85_v8 = vld [vmem:[#allocation5 + $0x20] sm:$0xff]  ;;  %v86_v9 = vld [vmem:[#allocation5 + $0x28] sm:$0xff]  ;;  %v177_v12 = vld [vmem:[#allocation7 + $0x10] sm:$0xff]  ;;  %s369_s29 = sshll.u32 %s750_s28, 4  ;;  %s370_s29 = int_to_ptr.vmem [resolvable:$true] %s369_s29 }
  0x4c   :  { %v175_v10 = vld [vmem:[#allocation7] sm:$0xff]  ;;  %v176_v11 = vld [vmem:[#allocation7 + $0x8] sm:$0xff]  ;;  %v178_v13 = vld [vmem:[#allocation7 + $0x18] sm:$0xff]  ;;  %v546_v14 = vpack.c.bf16 %v86_v9, %v85_v8  ;;  %s711_s30 = scalar_lea.vmem %s370_s29, 128  ;;  %p716_p5 = scmp.lt.s32.totalorder %s370_s29, %s370_s29 }
  0x4d   :  { %541 = vmatpush3.bf16.msra.mxu0 %v540_v5  ;;  %v564_v15 = vpack.c.bf16 %v176_v11, %v175_v10  ;;  %v87_v16 = vld [vmem:[#allocation5 + $0x30] sm:$0xff]  ;;  %v88_v17 = vld [vmem:[#allocation5 + $0x38] sm:$0xff]  ;;  %v567_v18 = vpack.c.bf16 %v178_v13, %v177_v12  ;;  %v179_v19 = vld [vmem:[#allocation7 + $0x20] sm:$0xff]  ;;  %p712_p4 = scmp.ne.s32.totalorder %s370_s29, %s711_s30  ;;  %p717_p6 = scmp.lt.s32.totalorder %s711_s30, %s711_s30 }
  0x4e   :  { %542 = vmatprep.subr.bf16.mxu0 %v747_v0  ;;  %v180_v20 = vld [vmem:[#allocation7 + $0x28] sm:$0xff]  ;;  %v549_v21 = vpack.c.bf16 %v88_v17, %v87_v16  ;;  %v89_v22 = vld [vmem:[#allocation5 + $0x40] sm:$0xff]  ;;  %v181_v25 = vld [vmem:[#allocation7 + $0x30] sm:$0xff] }
  0x4f   :  { %565 = vmatpush3.bf16.msra.mxu1 %v564_v15  ;;  %v90_v23 = vld [vmem:[#allocation5 + $0x48] sm:$0xff]  ;;  %v570_v24 = vpack.c.bf16 %v180_v20, %v179_v19  ;;  %v182_v26 = vld [vmem:[#allocation7 + $0x38] sm:$0xff]  ;;  %v91_v28 = vld [vmem:[#allocation5 + $0x50] sm:$0xff]  ;;  %p718_p7 = por %p717_p6, %p716_p5 }
  0x50   :  { %566 = vmatprep.subr.bf16.mxu1 %v747_v0  ;;  %v552_v27 = vpack.c.bf16 %v90_v23, %v89_v22  ;;  %v92_v29 = vld [vmem:[#allocation5 + $0x58] sm:$0xff]  ;;  %v573_v30 = vpack.c.bf16 %v182_v26, %v181_v25  ;;  %v183_v31 = vld [vmem:[#allocation7 + $0x40] sm:$0xff]  ;;  %v184_v32 = vld [vmem:[#allocation7 + $0x48] sm:$0xff] }
  0x51   :  { %544 = vmatpush3.bf16.msra.mxu0 %v543_v7  ;;  %v555_v33 = vpack.c.bf16 %v92_v29, %v91_v28  ;;  %v93_v34 = vld [vmem:[#allocation5 + $0x60] sm:$0xff]  ;;  %v94_v35 = vld [vmem:[#allocation5 + $0x68] sm:$0xff]  ;;  %v576_v36 = vpack.c.bf16 %v184_v32, %v183_v31  ;;  %v95_v38 = vld [vmem:[#allocation5 + $0x70] sm:$0xff]  ;;  %p719_p8 = pnand %p718_p7, %p712_p4 }
  0x52   :  { %545 = vmatprep.subr.bf16.mxu0 %v747_v0  ;;  %v558_v37 = vpack.c.bf16 %v94_v35, %v93_v34  ;;  %v96_v39 = vld [vmem:[#allocation5 + $0x78] sm:$0xff]  ;;  %v185_v42 = vld [vmem:[#allocation7 + $0x50] sm:$0xff]  ;;  %v187_v45 = vld [vmem:[#allocation7 + $0x60] sm:$0xff] }
  0x53   :  { %568 = vmatpush3.bf16.msra.mxu1 %v567_v18  ;;  %v561_v40 = vpack.c.bf16 %v96_v39, %v95_v38  ;;  %v80_v41 = vld [vmem:[#allocation2] sm:$0xff]  ;;  %v188_v46 = vld [vmem:[#allocation7 + $0x68] sm:$0xff]  ;;  %v189_v48 = vld [vmem:[#allocation7 + $0x70] sm:$0xff] }
  0x54   :  { %569 = vmatprep.subr.bf16.mxu1 %v747_v0  ;;  %v186_v43 = vld [vmem:[#allocation7 + $0x58] sm:$0xff]  ;;  %v582_v47 = vpack.c.bf16 %v188_v46, %v187_v45  ;;  %v269_v51 = vld [vmem:[#allocation8] sm:$0xff]  ;;  %v270_v52 = vld [vmem:[#allocation8 + $0x8] sm:$0xff] }
  0x55   :  { %547 = vmatpush3.bf16.msra.mxu0 %v546_v14  ;;  %v579_v44 = vpack.c.bf16 %v186_v43, %v185_v42  ;;  %v190_v49 = vld [vmem:[#allocation7 + $0x78] sm:$0xff]  ;;  %v271_v53 = vld [vmem:[#allocation8 + $0x10] sm:$0xff]  ;;  %v588_v54 = vpack.c.bf16 %v270_v52, %v269_v51  ;;  %v273_v57 = vld [vmem:[#allocation8 + $0x20] sm:$0xff] }
  0x56   :  { %548 = vmatprep.subr.bf16.mxu0 %v747_v0  ;;  %v585_v50 = vpack.c.bf16 %v190_v49, %v189_v48  ;;  %v272_v55 = vld [vmem:[#allocation8 + $0x18] sm:$0xff]  ;;  %v274_v58 = vld [vmem:[#allocation8 + $0x28] sm:$0xff]  ;;  %v275_v60 = vld [vmem:[#allocation8 + $0x30] sm:$0xff] }
  0x57   :  { %571 = vmatpush3.bf16.msra.mxu1 %v570_v24  ;;  %v591_v56 = vpack.c.bf16 %v272_v55, %v271_v53  ;;  %v594_v59 = vpack.c.bf16 %v274_v58, %v273_v57  ;;  %v276_v61 = vld [vmem:[#allocation8 + $0x38] sm:$0xff]  ;;  %v277_v63 = vld [vmem:[#allocation8 + $0x40] sm:$0xff]  ;;  %v279_v3 = vld [vmem:[#allocation8 + $0x50] sm:$0xff] }
  0x58   :  { %572 = vmatprep.subr.bf16.mxu1 %v747_v0  ;;  %v597_v62 = vpack.c.bf16 %v276_v61, %v275_v60  ;;  %v280_v4 = vld [vmem:[#allocation8 + $0x58] sm:$0xff]  ;;  %v281_v6 = vld [vmem:[#allocation8 + $0x60] sm:$0xff]  ;;  %v282_v7 = vld [vmem:[#allocation8 + $0x68] sm:$0xff] }
  0x59   :  { %550 = vmatpush3.bf16.msra.mxu0 %v549_v21  ;;  %v603_v5 = vpack.c.bf16 %v280_v4, %v279_v3  ;;  %v606_v8 = vpack.c.bf16 %v282_v7, %v281_v6  ;;  %v380_v9 = vld [vmem:[%s901_s2] ss:$0 sm:$0xff]  ;;  %v283_v14 = vld [vmem:[#allocation8 + $0x70] sm:$0xff] }
  0x5a   :  { %551 = vmatprep.subr.bf16.mxu0 %v747_v0  ;;  %v284_v15 = vld [vmem:[#allocation8 + $0x78] sm:$0xff] }
  0x5b   :  { %574 = vmatpush3.bf16.msra.mxu1 %v573_v30  ;;  %v609_v16 = vpack.c.bf16 %v284_v15, %v283_v14  ;;  %v381_v17 = vld [vmem:[%s903_s4] ss:$0 sm:$0xff] }
  0x5c   :  { %575 = vmatprep.subr.bf16.mxu1 %v747_v0  ;;  %v382_v21 = vld [vmem:[%s905_s6] ss:$0 sm:$0xff] }
  0x5d   :  { %553 = vmatpush3.bf16.msra.mxu0 %v552_v27 }
  0x5e   :  { %554 = vmatprep.subr.bf16.mxu0 %v747_v0 }
  0x5f   :  { %577 = vmatpush3.bf16.msra.mxu1 %v576_v36 }
  0x60   :  { %578 = vmatprep.subr.bf16.mxu1 %v747_v0 }
  0x61   :  { %556 = vmatpush3.bf16.msra.mxu0 %v555_v33 }
  0x62   :  { %557 = vmatprep.subr.bf16.mxu0 %v747_v0 }
  0x63   :  { %580 = vmatpush3.bf16.msra.mxu1 %v579_v44 }
  0x64   :  { %581 = vmatprep.subr.bf16.mxu1 %v747_v0 }
  0x65   :  { %559 = vmatpush3.bf16.msra.mxu0 %v558_v37 }
  0x66   :  { %560 = vmatprep.subr.bf16.mxu0 %v747_v0 }
  0x67   :  { %583 = vmatpush3.bf16.msra.mxu1 %v582_v47 }
  0x68   :  { %584 = vmatprep.subr.bf16.mxu1 %v747_v0 }
  0x69   :  { %562 = vmatpush3.bf16.msra.mxu0 %v561_v40 }
  0x6a   :  { %587 = vmatprep.subr.bf16.mxu0 %v747_v0 }
  0x6b   :  { %586 = vmatpush3.bf16.msra.mxu1 %v585_v50 }
  0x6c   :  { %467 = vmatmul.mubr.f32.vlgmr.msra.gmra.mrb[0].mxu0 %v80_v41 }
  0x6d   :  { %536 = vmatprep.mubr.msk.f32.mxu0 %vm748_vm0, %v749_v1  ;;  %589 = vmatpush3.bf16.msra.mxu0 %v588_v54  ;;  %v278_v1 = vld [vmem:[#allocation8 + $0x48] sm:$0xff] }
  0x6e   :  { %590 = vmatprep.subr.bf16.mxu0 %v747_v0  ;;  %v600_v2 = vpack.c.bf16 %v278_v1, %v277_v63 }
  0x71   :  { %592 = vmatpush3.bf16.msra.mxu0 %v591_v56 }
  0x72   :  { %593 = vmatprep.subr.bf16.mxu0 %v747_v0 }
  0x75   :  { %595 = vmatpush3.bf16.msra.mxu0 %v594_v59 }
  0x76   :  { %596 = vmatprep.subr.bf16.mxu0 %v747_v0 }
  0x79   :  { %598 = vmatpush3.bf16.msra.mxu0 %v597_v62 }
  0x7a   :  { %599 = vmatprep.subr.bf16.mxu0 %v747_v0 }
  0x7d   :  { %601 = vmatpush3.bf16.msra.mxu0 %v600_v2 }
  0x7e   :  { %602 = vmatprep.subr.bf16.mxu0 %v747_v0 }
  0x81   :  { %604 = vmatpush3.bf16.msra.mxu0 %v603_v5 }
  0x82   :  { %605 = vmatprep.subr.bf16.mxu0 %v747_v0 }
  0x85   :  { %607 = vmatpush3.bf16.msra.mxu0 %v606_v8 }
  0x86   :  { %608 = vmatprep.subr.bf16.mxu0 %v747_v0 }
  0x89   :  { %610 = vmatpush3.bf16.msra.mxu0 %v609_v16 }
 0x13f   :  { %v170_v10 = vpop.f32.mrb[0].mxu0 }
 0x140   :  { %v171_v11 = vadd.f32 %v380_v9, %v170_v10  ;;  %v468_v12 = vpop.f32.mrb[1].mxu0 }
 0x142   :  { %621 = vtanh.f32 %v171_v11 }
 0x14c   :  { %v622_v13 = vpop.eup %621 }
 0x14d   :  { %502 = vmatmul.mubr.f32.vlgmr.msra.gmra.mrb[0].mxu1 %v622_v13 }
 0x220   :  { %v264_v18 = vpop.f32.mrb[0].mxu1 }
 0x221   :  { %v265_v0 = vadd.f32 %v381_v17, %v264_v18  ;;  %v503_v19 = vpop.f32.mrb[1].mxu1 }
 0x223   :  { %v268_v20 = vmax.f32 %v265_v0, 0.0 }
 0x225   :  { %537 = vmatmul.mubr.f32.vlgmr.msra.gmra.mrb[2].mxu0 %v268_v20 }
 0x2f8   :  { %v358_v22 = vpop.f32.mrb[2].mxu0 }
 0x2f9   :  { %v359_v23 = vadd.f32 %v382_v21, %v358_v22  ;;  %v538_v24 = vpop.f32.mrb[3].mxu0 }
 0x2fb   :  { %362 = vst [vmem:[#allocation10] sm:$0xff] %v359_v23 }
 0x2fc   :  { %722 = shalt.err (!%p719_p8)
}
 0x2fd   :  { %s723_s9 = scalar_lea.hbm %s906_s7, 128 }
 0x2fe   :  { %p724_p9 = scmp.ne.s32.totalorder %s906_s7, %s723_s9  ;;  %p727_p10 = scmp.lt.u32.totalorder %s723_s9, %s906_s7 }
 0x300   :  { %p729_p11 = pnand %p727_p10, %p724_p9 }
 0x302   :  { %732 = shalt.err (!%p729_p11)
}
 0x303   :  { %372 = dma.vmem_to_hbm [thread:$0]  %s370_s29, 128, %s906_s7, [#allocation4]  }
 0x304   :  { %739 = dma.done.wait [#allocation4], 128  }
 0x305   :  { %740 = vsyncadd [#allocation4], 4294967168 }
 0x306   :  { %376 = vsyncpa [#allocation3], 1 }
 0x307   :  { %377 = vsyncpa [#allocation6], 1 }
 0x308   :  { %378 = vsyncpa [#allocation9], 1 }
 0x309   :  { %379 = vsyncpa [#allocation4], 1 }

// kernel: tpu_custom_call.1
= control target key start
LH: loop header
LB: loop body
LE: loop exit
PB: predicated region body
PF: predicated region fallthrough
CT: control target
= control target key end

     0   :  { %12 = vsyncpa [#allocation3], 0  ;;  %s899_s0 = inlined_call_operand.hbm [shape: f32[8,128], index: 0, kind: input, shape index: {}]   ;;  %s900_s1 = inlined_call_operand.hbm [shape: f32[128,128], index: 1, kind: input, shape index: {}]   ;;  %s901_s2 = inlined_call_operand.vmem [shape: f32[1,128], index: 2, kind: input, shape index: {}]   ;;  %s902_s3 = inlined_call_operand.hbm [shape: f32[128,128], index: 3, kind: input, shape index: {}]   ;;  %s903_s4 = inlined_call_operand.vmem [shape: f32[1,128], index: 4, kind: input, shape index: {}]   ;;  %s904_s5 = inlined_call_operand.hbm [shape: f32[128,128], index: 5, kind: input, shape index: {}]   ;;  %s905_s6 = inlined_call_operand.vmem [shape: f32[1,128], index: 6, kind: input, shape index: {}]   ;;  %s906_s7 = inlined_call_operand.hbm [shape: f32[8,128], index: 7, kind: output, shape index: {}]  }
   0x1   :  { %13 = vsyncpa [#allocation6], 0 }
   0x2   :  { %14 = vsyncpa [#allocation9], 0 }
   0x3   :  { %15 = vsyncpa [#allocation4], 0  ;;  %s741_s24 = smov [#allocation5]   ;;  %s623_s28 = scalar_lea.hbm %s900_s1, 2048 }
   0x4   :  { %s31_s25 = sshll.u32 %s741_s24, 4  ;;  %p624_p0 = scmp.ne.s32.totalorder %s900_s1, %s623_s28  ;;  %s32_s25 = int_to_ptr.vmem [resolvable:$true] %s31_s25 }
   0x5   :  { %p627_p1 = scmp.lt.u32.totalorder %s623_s28, %s900_s1 }
   0x7   :  { %p629_p2 = pnand %p627_p1, %p624_p0 }
   0x9   :  { %632 = shalt.err (!%p629_p2)
}
   0xa   :  { %s633_s10 = scalar_lea.vmem %s32_s25, 2048  ;;  %p638_p4 = scmp.lt.s32.totalorder %s32_s25, %s32_s25 }
   0xb   :  { %p634_p3 = scmp.ne.s32.totalorder %s32_s25, %s633_s10  ;;  %p639_p5 = scmp.lt.s32.totalorder %s633_s10, %s633_s10 }
   0xd   :  { %p640_p6 = por %p639_p5, %p638_p4 }
   0xf   :  { %p641_p7 = pnand %p640_p6, %p634_p3 }
  0x11   :  { %644 = shalt.err (!%p641_p7)
}
  0x12   :  { %s742_s11 = smov 128   ;;  %s743_s12 = smov 8  }
  0x13   :  { %37 = dma.hbm_to_vmem [thread:$0]  %s900_s1, 2048, %s32_s25, [#allocation6], %s742_s11, %s742_s11, %s743_s12  }
  0x14   :  { %s744_s15 = smov [#allocation2]   ;;  %s745_s17 = smov [#allocation7]  }
  0x15   :  { %s22_s16 = sshll.u32 %s744_s15, 4  ;;  %s45_s18 = sshll.u32 %s745_s17, 4  ;;  %s23_s16 = int_to_ptr.vmem [resolvable:$true] %s22_s16  ;;  %s46_s18 = int_to_ptr.vmem [resolvable:$true] %s45_s18 }
  0x16   :  { %s645_s21 = scalar_lea.hbm %s899_s0, 128 }
  0x17   :  { %p646_p8 = scmp.ne.s32.totalorder %s899_s0, %s645_s21  ;;  %p649_p9 = scmp.lt.u32.totalorder %s645_s21, %s899_s0 }
  0x19   :  { %p651_p10 = pnand %p649_p9, %p646_p8 }
  0x1b   :  { %654 = shalt.err (!%p651_p10)
}
  0x1c   :  { %s655_s1 = scalar_lea.vmem %s23_s16, 128  ;;  %p660_p12 = scmp.lt.s32.totalorder %s23_s16, %s23_s16 }
  0x1d   :  { %p656_p11 = scmp.ne.s32.totalorder %s23_s16, %s655_s1  ;;  %p661_p13 = scmp.lt.s32.totalorder %s655_s1, %s655_s1 }
  0x1f   :  { %p662_p0 = por %p661_p13, %p660_p12 }
  0x21   :  { %p663_p1 = pnand %p662_p0, %p656_p11 }
  0x23   :  { %666 = shalt.err (!%p663_p1)
}
  0x24   :  { %25 = dma.hbm_to_vmem [thread:$0]  %s899_s0, 128, %s23_s16, [#allocation3]  }
  0x25   :  { %s667_s30 = scalar_lea.hbm %s902_s3, 2048 }
  0x26   :  { %p668_p2 = scmp.ne.s32.totalorder %s902_s3, %s667_s30  ;;  %p671_p3 = scmp.lt.u32.totalorder %s667_s30, %s902_s3 }
  0x28   :  { %p673_p4 = pnand %p671_p3, %p668_p2 }
  0x2a   :  { %676 = shalt.err (!%p673_p4)
}
  0x2b   :  { %s677_s14 = scalar_lea.vmem %s46_s18, 2048  ;;  %p682_p6 = scmp.lt.s32.totalorder %s46_s18, %s46_s18 }
  0x2c   :  { %p678_p5 = scmp.ne.s32.totalorder %s46_s18, %s677_s14  ;;  %p683_p7 = scmp.lt.s32.totalorder %s677_s14, %s677_s14 }
  0x2e   :  { %p684_p8 = por %p683_p7, %p682_p6 }
  0x30   :  { %p685_p9 = pnand %p684_p8, %p678_p5 }
  0x32   :  { %688 = shalt.err (!%p685_p9)
}
  0x33   :  { %51 = dma.hbm_to_vmem [thread:$0]  %s902_s3, 2048, %s46_s18, [#allocation6], %s742_s11, %s742_s11, %s743_s12  }
  0x34   :  { %s746_s16 = smov [#allocation8]   ;;  %s689_s21 = scalar_lea.hbm %s904_s5, 2048 }
  0x35   :  { %s59_s17 = sshll.u32 %s746_s16, 4  ;;  %p690_p10 = scmp.ne.s32.totalorder %s904_s5, %s689_s21  ;;  %s60_s17 = int_to_ptr.vmem [resolvable:$true] %s59_s17 }
  0x36   :  { %p693_p11 = scmp.lt.u32.totalorder %s689_s21, %s904_s5 }
  0x38   :  { %p695_p12 = pnand %p693_p11, %p690_p10 }
  0x3a   :  { %698 = shalt.err (!%p695_p12)
}
  0x3b   :  { %s699_s1 = scalar_lea.vmem %s60_s17, 2048  ;;  %p704_p0 = scmp.lt.s32.totalorder %s60_s17, %s60_s17 }
  0x3c   :  { %p700_p13 = scmp.ne.s32.totalorder %s60_s17, %s699_s1  ;;  %p705_p1 = scmp.lt.s32.totalorder %s699_s1, %s699_s1 }
  0x3e   :  { %p706_p2 = por %p705_p1, %p704_p0 }
  0x40   :  { %p707_p3 = pnand %p706_p2, %p700_p13 }
  0x42   :  { %710 = shalt.err (!%p707_p3)
}
  0x43   :  { %65 = dma.hbm_to_vmem [thread:$0]  %s904_s5, 2048, %s60_s17, [#allocation9], %s742_s11, %s742_s11, %s743_s12  }
  0x44   :  { %733 = dma.done.wait [#allocation3], 128  }
  0x45   :  { %734 = vsyncadd [#allocation3], 4294967168 }
  0x46   :  { %735 = dma.done.wait [#allocation6], 4096  }
  0x47   :  { %736 = vsyncadd [#allocation6], 4294963200 }
  0x48   :  { %737 = dma.done.wait [#allocation9], 2048  }
  0x49   :  { %738 = vsyncadd [#allocation9], 4294965248  ;;  %v747_v0 = vmov 0.0|0.0   ;;  %vm748_vm0 = vmmov 0   ;;  %v749_v1 = vmov 0.0   ;;  %v81_v2 = vld [vmem:[#allocation5] sm:$0xff] }
  0x4a   :  { %539 = vmatprep.subr.bf16.mxu0 %v747_v0  ;;  %466 = vmatprep.mubr.msk.f32.mxu0 %vm748_vm0, %v749_v1  ;;  %v82_v3 = vld [vmem:[#allocation5 + $0x8] sm:$0xff]  ;;  %v83_v4 = vld [vmem:[#allocation5 + $0x10] sm:$0xff]  ;;  %v84_v6 = vld [vmem:[#allocation5 + $0x18] sm:$0xff]  ;;  %s750_s28 = smov [#allocation10]  }
  0x4b   :  { %563 = vmatprep.subr.bf16.mxu1 %v747_v0  ;;  %501 = vmatprep.mubr.msk.f32.mxu1 %vm748_vm0, %v749_v1  ;;  %v540_v5 = vpack.c.bf16 %v82_v3, %v81_v2  ;;  %v543_v7 = vpack.c.bf16 %v84_v6, %v83_v4  ;;  %v85_v8 = vld [vmem:[#allocation5 + $0x20] sm:$0xff]  ;;  %v86_v9 = vld [vmem:[#allocation5 + $0x28] sm:$0xff]  ;;  %v177_v12 = vld [vmem:[#allocation7 + $0x10] sm:$0xff]  ;;  %s369_s29 = sshll.u32 %s750_s28, 4  ;;  %s370_s29 = int_to_ptr.vmem [resolvable:$true] %s369_s29 }
  0x4c   :  { %v175_v10 = vld [vmem:[#allocation7] sm:$0xff]  ;;  %v176_v11 = vld [vmem:[#allocation7 + $0x8] sm:$0xff]  ;;  %v178_v13 = vld [vmem:[#allocation7 + $0x18] sm:$0xff]  ;;  %v546_v14 = vpack.c.bf16 %v86_v9, %v85_v8  ;;  %s711_s30 = scalar_lea.vmem %s370_s29, 128  ;;  %p716_p5 = scmp.lt.s32.totalorder %s370_s29, %s370_s29 }
  0x4d   :  { %541 = vmatpush3.bf16.msra.mxu0 %v540_v5  ;;  %v564_v15 = vpack.c.bf16 %v176_v11, %v175_v10  ;;  %v87_v16 = vld [vmem:[#allocation5 + $0x30] sm:$0xff]  ;;  %v88_v17 = vld [vmem:[#allocation5 + $0x38] sm:$0xff]  ;;  %v567_v18 = vpack.c.bf16 %v178_v13, %v177_v12  ;;  %v179_v19 = vld [vmem:[#allocation7 + $0x20] sm:$0xff]  ;;  %p712_p4 = scmp.ne.s32.totalorder %s370_s29, %s711_s30  ;;  %p717_p6 = scmp.lt.s32.totalorder %s711_s30, %s711_s30 }
  0x4e   :  { %542 = vmatprep.subr.bf16.mxu0 %v747_v0  ;;  %v180_v20 = vld [vmem:[#allocation7 + $0x28] sm:$0xff]  ;;  %v549_v21 = vpack.c.bf16 %v88_v17, %v87_v16  ;;  %v89_v22 = vld [vmem:[#allocation5 + $0x40] sm:$0xff]  ;;  %v181_v25 = vld [vmem:[#allocation7 + $0x30] sm:$0xff] }
  0x4f   :  { %565 = vmatpush3.bf16.msra.mxu1 %v564_v15  ;;  %v90_v23 = vld [vmem:[#allocation5 + $0x48] sm:$0xff]  ;;  %v570_v24 = vpack.c.bf16 %v180_v20, %v179_v19  ;;  %v182_v26 = vld [vmem:[#allocation7 + $0x38] sm:$0xff]  ;;  %v91_v28 = vld [vmem:[#allocation5 + $0x50] sm:$0xff]  ;;  %p718_p7 = por %p717_p6, %p716_p5 }
  0x50   :  { %566 = vmatprep.subr.bf16.mxu1 %v747_v0  ;;  %v552_v27 = vpack.c.bf16 %v90_v23, %v89_v22  ;;  %v92_v29 = vld [vmem:[#allocation5 + $0x58] sm:$0xff]  ;;  %v573_v30 = vpack.c.bf16 %v182_v26, %v181_v25  ;;  %v183_v31 = vld [vmem:[#allocation7 + $0x40] sm:$0xff]  ;;  %v184_v32 = vld [vmem:[#allocation7 + $0x48] sm:$0xff] }
  0x51   :  { %544 = vmatpush3.bf16.msra.mxu0 %v543_v7  ;;  %v555_v33 = vpack.c.bf16 %v92_v29, %v91_v28  ;;  %v93_v34 = vld [vmem:[#allocation5 + $0x60] sm:$0xff]  ;;  %v94_v35 = vld [vmem:[#allocation5 + $0x68] sm:$0xff]  ;;  %v576_v36 = vpack.c.bf16 %v184_v32, %v183_v31  ;;  %v95_v38 = vld [vmem:[#allocation5 + $0x70] sm:$0xff]  ;;  %p719_p8 = pnand %p718_p7, %p712_p4 }
  0x52   :  { %545 = vmatprep.subr.bf16.mxu0 %v747_v0  ;;  %v558_v37 = vpack.c.bf16 %v94_v35, %v93_v34  ;;  %v96_v39 = vld [vmem:[#allocation5 + $0x78] sm:$0xff]  ;;  %v185_v42 = vld [vmem:[#allocation7 + $0x50] sm:$0xff]  ;;  %v187_v45 = vld [vmem:[#allocation7 + $0x60] sm:$0xff] }
  0x53   :  { %568 = vmatpush3.bf16.msra.mxu1 %v567_v18  ;;  %v561_v40 = vpack.c.bf16 %v96_v39, %v95_v38  ;;  %v80_v41 = vld [vmem:[#allocation2] sm:$0xff]  ;;  %v188_v46 = vld [vmem:[#allocation7 + $0x68] sm:$0xff]  ;;  %v189_v48 = vld [vmem:[#allocation7 + $0x70] sm:$0xff] }
  0x54   :  { %569 = vmatprep.subr.bf16.mxu1 %v747_v0  ;;  %v186_v43 = vld [vmem:[#allocation7 + $0x58] sm:$0xff]  ;;  %v582_v47 = vpack.c.bf16 %v188_v46, %v187_v45  ;;  %v269_v51 = vld [vmem:[#allocation8] sm:$0xff]  ;;  %v270_v52 = vld [vmem:[#allocation8 + $0x8] sm:$0xff] }
  0x55   :  { %547 = vmatpush3.bf16.msra.mxu0 %v546_v14  ;;  %v579_v44 = vpack.c.bf16 %v186_v43, %v185_v42  ;;  %v190_v49 = vld [vmem:[#allocation7 + $0x78] sm:$0xff]  ;;  %v271_v53 = vld [vmem:[#allocation8 + $0x10] sm:$0xff]  ;;  %v588_v54 = vpack.c.bf16 %v270_v52, %v269_v51  ;;  %v273_v57 = vld [vmem:[#allocation8 + $0x20] sm:$0xff] }
  0x56   :  { %548 = vmatprep.subr.bf16.mxu0 %v747_v0  ;;  %v585_v50 = vpack.c.bf16 %v190_v49, %v189_v48  ;;  %v272_v55 = vld [vmem:[#allocation8 + $0x18] sm:$0xff]  ;;  %v274_v58 = vld [vmem:[#allocation8 + $0x28] sm:$0xff]  ;;  %v275_v60 = vld [vmem:[#allocation8 + $0x30] sm:$0xff] }
  0x57   :  { %571 = vmatpush3.bf16.msra.mxu1 %v570_v24  ;;  %v591_v56 = vpack.c.bf16 %v272_v55, %v271_v53  ;;  %v594_v59 = vpack.c.bf16 %v274_v58, %v273_v57  ;;  %v276_v61 = vld [vmem:[#allocation8 + $0x38] sm:$0xff]  ;;  %v277_v63 = vld [vmem:[#allocation8 + $0x40] sm:$0xff]  ;;  %v279_v3 = vld [vmem:[#allocation8 + $0x50] sm:$0xff] }
  0x58   :  { %572 = vmatprep.subr.bf16.mxu1 %v747_v0  ;;  %v597_v62 = vpack.c.bf16 %v276_v61, %v275_v60  ;;  %v280_v4 = vld [vmem:[#allocation8 + $0x58] sm:$0xff]  ;;  %v281_v6 = vld [vmem:[#allocation8 + $0x60] sm:$0xff]  ;;  %v282_v7 = vld [vmem:[#allocation8 + $0x68] sm:$0xff] }
  0x59   :  { %550 = vmatpush3.bf16.msra.mxu0 %v549_v21  ;;  %v603_v5 = vpack.c.bf16 %v280_v4, %v279_v3  ;;  %v606_v8 = vpack.c.bf16 %v282_v7, %v281_v6  ;;  %v380_v9 = vld [vmem:[%s901_s2] ss:$0 sm:$0xff]  ;;  %v283_v14 = vld [vmem:[#allocation8 + $0x70] sm:$0xff] }
  0x5a   :  { %551 = vmatprep.subr.bf16.mxu0 %v747_v0  ;;  %v284_v15 = vld [vmem:[#allocation8 + $0x78] sm:$0xff] }
  0x5b   :  { %574 = vmatpush3.bf16.msra.mxu1 %v573_v30  ;;  %v609_v16 = vpack.c.bf16 %v284_v15, %v283_v14  ;;  %v381_v17 = vld [vmem:[%s903_s4] ss:$0 sm:$0xff] }
  0x5c   :  { %575 = vmatprep.subr.bf16.mxu1 %v747_v0  ;;  %v382_v21 = vld [vmem:[%s905_s6] ss:$0 sm:$0xff] }
  0x5d   :  { %553 = vmatpush3.bf16.msra.mxu0 %v552_v27 }
  0x5e   :  { %554 = vmatprep.subr.bf16.mxu0 %v747_v0 }
  0x5f   :  { %577 = vmatpush3.bf16.msra.mxu1 %v576_v36 }
  0x60   :  { %578 = vmatprep.subr.bf16.mxu1 %v747_v0 }
  0x61   :  { %556 = vmatpush3.bf16.msra.mxu0 %v555_v33 }
  0x62   :  { %557 = vmatprep.subr.bf16.mxu0 %v747_v0 }
  0x63   :  { %580 = vmatpush3.bf16.msra.mxu1 %v579_v44 }
  0x64   :  { %581 = vmatprep.subr.bf16.mxu1 %v747_v0 }
  0x65   :  { %559 = vmatpush3.bf16.msra.mxu0 %v558_v37 }
  0x66   :  { %560 = vmatprep.subr.bf16.mxu0 %v747_v0 }
  0x67   :  { %583 = vmatpush3.bf16.msra.mxu1 %v582_v47 }
  0x68   :  { %584 = vmatprep.subr.bf16.mxu1 %v747_v0 }
  0x69   :  { %562 = vmatpush3.bf16.msra.mxu0 %v561_v40 }
  0x6a   :  { %587 = vmatprep.subr.bf16.mxu0 %v747_v0 }
  0x6b   :  { %586 = vmatpush3.bf16.msra.mxu1 %v585_v50 }
  0x6c   :  { %467 = vmatmul.mubr.f32.vlgmr.msra.gmra.mrb[0].mxu0 %v80_v41 }
  0x6d   :  { %536 = vmatprep.mubr.msk.f32.mxu0 %vm748_vm0, %v749_v1  ;;  %589 = vmatpush3.bf16.msra.mxu0 %v588_v54  ;;  %v278_v1 = vld [vmem:[#allocation8 + $0x48] sm:$0xff] }
  0x6e   :  { %590 = vmatprep.subr.bf16.mxu0 %v747_v0  ;;  %v600_v2 = vpack.c.bf16 %v278_v1, %v277_v63 }
  0x71   :  { %592 = vmatpush3.bf16.msra.mxu0 %v591_v56 }
  0x72   :  { %593 = vmatprep.subr.bf16.mxu0 %v747_v0 }
  0x75   :  { %595 = vmatpush3.bf16.msra.mxu0 %v594_v59 }
  0x76   :  { %596 = vmatprep.subr.bf16.mxu0 %v747_v0 }
  0x79   :  { %598 = vmatpush3.bf16.msra.mxu0 %v597_v62 }
  0x7a   :  { %599 = vmatprep.subr.bf16.mxu0 %v747_v0 }
  0x7d   :  { %601 = vmatpush3.bf16.msra.mxu0 %v600_v2 }
  0x7e   :  { %602 = vmatprep.subr.bf16.mxu0 %v747_v0 }
  0x81   :  { %604 = vmatpush3.bf16.msra.mxu0 %v603_v5 }
  0x82   :  { %605 = vmatprep.subr.bf16.mxu0 %v747_v0 }
  0x85   :  { %607 = vmatpush3.bf16.msra.mxu0 %v606_v8 }
  0x86   :  { %608 = vmatprep.subr.bf16.mxu0 %v747_v0 }
  0x89   :  { %610 = vmatpush3.bf16.msra.mxu0 %v609_v16 }
 0x13f   :  { %v170_v10 = vpop.f32.mrb[0].mxu0 }
 0x140   :  { %v171_v11 = vadd.f32 %v380_v9, %v170_v10  ;;  %v468_v12 = vpop.f32.mrb[1].mxu0 }
 0x142   :  { %621 = vtanh.f32 %v171_v11 }
 0x14c   :  { %v622_v13 = vpop.eup %621 }
 0x14d   :  { %502 = vmatmul.mubr.f32.vlgmr.msra.gmra.mrb[0].mxu1 %v622_v13 }
 0x220   :  { %v264_v18 = vpop.f32.mrb[0].mxu1 }
 0x221   :  { %v265_v0 = vadd.f32 %v381_v17, %v264_v18  ;;  %v503_v19 = vpop.f32.mrb[1].mxu1 }
 0x223   :  { %v268_v20 = vmax.f32 %v265_v0, 0.0 }
 0x225   :  { %537 = vmatmul.mubr.f32.vlgmr.msra.gmra.mrb[2].mxu0 %v268_v20 }
 0x2f8   :  { %v358_v22 = vpop.f32.mrb[2].mxu0 }
 0x2f9   :  { %v359_v23 = vadd.f32 %v382_v21, %v358_v22  ;;  %v538_v24 = vpop.f32.mrb[3].mxu0 }
 0x2fb   :  { %362 = vst [vmem:[#allocation10] sm:$0xff] %v359_v23 }
 0x2fc   :  { %722 = shalt.err (!%p719_p8)
}
 0x2fd   :  { %s723_s9 = scalar_lea.hbm %s906_s7, 128 }
 0x2fe   :  { %p724_p9 = scmp.ne.s32.totalorder %s906_s7, %s723_s9  ;;  %p727_p10 = scmp.lt.u32.totalorder %s723_s9, %s906_s7 }
 0x300   :  { %p729_p11 = pnand %p727_p10, %p724_p9 }
 0x302   :  { %732 = shalt.err (!%p729_p11)
}
 0x303   :  { %372 = dma.vmem_to_hbm [thread:$0]  %s370_s29, 128, %s906_s7, [#allocation4]  }
 0x304   :  { %739 = dma.done.wait [#allocation4], 128  }
 0x305   :  { %740 = vsyncadd [#allocation4], 4294967168 }
 0x306   :  { %376 = vsyncpa [#allocation3], 1 }
 0x307   :  { %377 = vsyncpa [#allocation6], 1 }
 0x308   :  { %378 = vsyncpa [#allocation9], 1 }
 0x309   :  { %379 = vsyncpa [#allocation4], 1 }

</bundles_post_ra>
